<compile_context>
chip_gen: v7x
topology: tpu7x:2x2x1
jax: 0.10.0
libtpu: 0.0.40
codegen_flags: <defaults>
</compile_context>

<pallas_src>
import jax
import jax.numpy as jnp
import numpy as np
from jax.experimental import pallas as pl
from jax.experimental.pallas import tpu as pltpu

# Loss-combination weights from CombinedLoss.__init__ defaults.
W_TRANSFORM = 0.5
W_MATCH = 0.5
W_TRANSLATION = 0.5
W_ROTATION = 0.5

_LANE_BLOCK = 32768    # batch rows per grid step (multiple of 128)
_NEG_BIG = -1.0e4      # pad logit: BCE contribution is exactly 0 for pad rows


def _combined_loss_kernel(x_ref, out_ref, acc_ref):
    """Accumulate BCE / Huber / L1 partial sums over one dense row block.

    x_ref  : (10, RPB, 128) VMEM block; channel planes:
               0 pred_match, 1 gt_match, 2:6 pred_transform.T, 6:10 gt_transform.T
    out_ref: (1, 8, 128) VMEM block -- per parallel slice partial sums,
             rows 0..3 = [bce, rot(huber), l1, match_count], rows 4..7 = 0.
    acc_ref: (8, RPB, 128) f32 VMEM scratch (rows 4..7 stay zero).
    """
    step = pl.program_id(1)

    @pl.when(step == 0)
    def _init():
        acc_ref[...] = jnp.zeros_like(acc_ref)

    x = x_ref[...].astype(jnp.float32)        # (10, RPB, 128), all planes dense
    pm = x[0]                                 # match logits        (RPB, 128)
    gm = x[1]                                 # match labels {0,1}  (RPB, 128)

    # BCEWithLogits, numerically stable elementwise form.  Pad rows have
    # pm == -1e4, gm == 0  =>  contribution is exactly 0.
    bce = jnp.maximum(pm, 0.0) - pm * gm + jnp.log1p(jnp.exp(-jnp.abs(pm)))

    # Matched-row mask (gt_match == 1.0), exactly as the PyTorch reference.
    mask = (gm == 1.0).astype(jnp.float32)

    # One dense diff for all 4 transform channels; rows 0,1 = rotation (Huber),
    # rows 2,3 = translation (L1 == |d|).
    d = x[2:6] - x[6:10]                      # (4, RPB, 128)
    a = jnp.abs(d)
    huber = jnp.where(a < 1.0, 0.5 * d * d, a - 0.5)

    # Pure elementwise accumulation -- no cross-lane reductions in the loop.
    acc_ref[0] += bce
    acc_ref[1] += (huber[0] + huber[1]) * mask
    acc_ref[2] += (a[2] + a[3]) * mask
    acc_ref[3] += mask

    @pl.when(step == pl.num_programs(1) - 1)
    def _finalize():
        # One sublane reduction per channel plane; lane reduce + divisions and
        # weighting happen in the jitted wrapper.
        out_ref[...] = jnp.sum(acc_ref[...], axis=1)[None, :, :]


@jax.jit
def combined_loss_device(pred_match, pred_transform, gt_match, gt_transform):
    """Hot path (no host sync).  Returns an (8,) f32 device array:
       [combined, match, rotation, translation, transform, match_count, 0, 0].
       When match_count == 0 the rotation/translation/transform entries are 0.0."""
    b = pred_match.shape[0]

    pack_dtype = jnp.result_type(pred_match, gt_match, pred_transform, gt_transform)
    if not jnp.issubdtype(pack_dtype, jnp.floating):
        pack_dtype = jnp.float32

    # Tiling: rows -> (sublane-row blocks of 128 lanes); big blocks; optionally
    # two parallel slices so v7x can shard row blocks across its TensorCores.
    if b <= _LANE_BLOCK:
        b_pad = max(128, ((b + 127) // 128) * 128)
        rpb = b_pad // 128
        n_slices, blocks_per_slice = 1, 1
    else:
        rpb = _LANE_BLOCK // 128
        total_blocks = -(-b // _LANE_BLOCK)
        n_slices = 2
        blocks_per_slice = -(-total_blocks // n_slices)
        b_pad = n_slices * blocks_per_slice * _LANE_BLOCK
    pad = b_pad - b

    # Lane/sublane-dense packing: (10 channels, b_pad//128, 128).
    pm = jnp.pad(pred_match[:, 0].astype(pack_dtype), (0, pad),
                 constant_values=_NEG_BIG)
    gm = jnp.pad(gt_match[:, 0].astype(pack_dtype), (0, pad))
    pt = jnp.pad(pred_transform.astype(pack_dtype), ((0, pad), (0, 0)))
    gtf = jnp.pad(gt_transform.astype(pack_dtype), ((0, pad), (0, 0)))
    packed = jnp.concatenate([pm[None, :], gm[None, :], pt.T, gtf.T], axis=0)
    packed = packed.reshape(10, b_pad // 128, 128)

    nblk = blocks_per_slice
    partials = pl.pallas_call(
        _combined_loss_kernel,
        out_shape=jax.ShapeDtypeStruct((n_slices, 8, 128), jnp.float32),
        grid_spec=pltpu.PrefetchScalarGridSpec(
            num_scalar_prefetch=0,
            grid=(n_slices, blocks_per_slice),
            in_specs=[pl.BlockSpec((10, rpb, 128),
                                   lambda p, i: (0, p * nblk + i, 0))],
            out_specs=pl.BlockSpec((1, 8, 128), lambda p, i: (p, 0, 0)),
            scratch_shapes=[pltpu.VMEM((8, rpb, 128), jnp.float32)],
        ),
        compiler_params=pltpu.CompilerParams(
            dimension_semantics=("parallel", "arbitrary"),
            allow_input_fusion=[True],
        ),
    )(packed)

    # Tiny final combine (8 floats of work) in XLA.
    sums = jnp.sum(partials[:, :4, :], axis=(0, 2))          # (4,)
    bce_sum, rot_sum, l1_sum, count = sums[0], sums[1], sums[2], sums[3]

    match_loss = bce_sum / jnp.float32(b)                     # mean over true B rows
    denom = jnp.maximum(count, 1.0) * 2.0                     # matched rows * 2 dims
    rotation_loss = rot_sum / denom
    translation_loss = l1_sum / denom
    transform_loss = W_ROTATION * rotation_loss + W_TRANSLATION * translation_loss
    combined = jnp.where(count > 0.0,
                         W_TRANSFORM * transform_loss + W_MATCH * match_loss,
                         W_MATCH * match_loss)
    zero = jnp.float32(0.0)
    return jnp.stack([combined, match_loss, rotation_loss, translation_loss,
                      transform_loss, count, zero, zero])


def combined_loss(pred, gt):
    """Mirrors CombinedLoss.forward.  Building the PyTorch-style loss_info dict
    (Python floats / None entries) necessarily syncs the host once; use
    combined_loss_device() directly inside jit/scan/grad code."""
    pred_match, pred_transform = pred
    gt_match, gt_transform = gt
    packed = combined_loss_device(pred_match, pred_transform, gt_match, gt_transform)
    vals = np.asarray(jax.device_get(packed))
    combined, match_l, rot_l, tr_l, tf_l, count = [float(v) for v in vals[:6]]
    has_match = count > 0.0
    loss_info = {
        "match_loss": match_l,
        "rotation_loss": rot_l if has_match else None,
        "translation_loss": tr_l if has_match else None,
        "transform_loss": tf_l if has_match else None,
        "combined_loss": combined,
    }
    return combined, loss_info


def _reference(pred, gt):
    """NumPy reference of the PyTorch forward (float64, for verification)."""
    pm = np.asarray(pred[0], np.float64)[:, 0]
    gm = np.asarray(gt[0], np.float64)[:, 0]
    pt = np.asarray(pred[1], np.float64)
    gtf = np.asarray(gt[1], np.float64)
    bce = np.mean(np.maximum(pm, 0.0) - pm * gm + np.log1p(np.exp(-np.abs(pm))))
    idx = gm == 1.0
    if not idx.any():
        return float(W_MATCH * bce)
    d = pt[idx, :2] - gtf[idx, :2]
    huber = np.mean(np.where(np.abs(d) < 1.0, 0.5 * d * d, np.abs(d) - 0.5))
    l1 = np.mean(np.abs(pt[idx, 2:] - gtf[idx, 2:]))
    tf = W_ROTATION * huber + W_TRANSLATION * l1
    return float(W_TRANSFORM * tf + W_MATCH * bce)


if __name__ == "__main__":
    key = jax.random.PRNGKey(0)
    k1, k2, k3, k4, k5, k6, k7 = jax.random.split(key, 7)

    # --- small case, shapes consistent with the module ---
    B = 8
    pred_match = jax.random.normal(k1, (B, 1), dtype=jnp.float32) * 2.0
    gt_match = jnp.array([[1.0], [0.0], [1.0], [1.0], [0.0], [0.0], [1.0], [0.0]],
                         dtype=jnp.float32)
    pred_transform = jax.random.normal(k2, (B, 4), dtype=jnp.float32)
    gt_transform = jax.random.normal(k3, (B, 4), dtype=jnp.float32)

    packed = combined_loss_device(pred_match, pred_transform, gt_match, gt_transform)
    jax.block_until_ready(packed)

    out, loss_info = combined_loss((pred_match, pred_transform), (gt_match, gt_transform))
    ref = _reference((pred_match, pred_transform), (gt_match, gt_transform))
    assert abs(out - ref) < 1e-4, (out, ref)

    # --- no-match branch ---
    gt_match0 = jnp.zeros((B, 1), dtype=jnp.float32)
    out0, info0 = combined_loss((pred_match, pred_transform), (gt_match0, gt_transform))
    ref0 = _reference((pred_match, pred_transform), (gt_match0, gt_transform))
    assert abs(out0 - ref0) < 1e-4, (out0, ref0)
    assert info0["rotation_loss"] is None and info0["transform_loss"] is None

    # --- larger, multi-block / two-slice case (padding + tiled accumulation) ---
    B2 = 70000
    pm2 = jax.random.normal(k4, (B2, 1), dtype=jnp.float32) * 2.0
    gm2 = (jax.random.uniform(k5, (B2, 1)) > 0.5).astype(jnp.float32)
    pt2 = jax.random.normal(k6, (B2, 4), dtype=jnp.float32)
    gt2 = jax.random.normal(k7, (B2, 4), dtype=jnp.float32)
    out2, _ = combined_loss((pm2, pt2), (gm2, gt2))
    ref2 = _reference((pm2, pt2), (gm2, gt2))
    assert abs(out2 - ref2) < 1e-3 * max(1.0, abs(ref2)), (out2, ref2)

    print("KERNEL_OK")
</pallas_src>

<mosaic_0001>
module attributes {stable_mosaic.version = 11 : i64} {
  func.func @_combined_loss_kernel(%arg0: i32, %arg1: i32, %arg2: memref<10x1x128xf32, #tpu.memory_space<vmem>>, %arg3: memref<1x8x128xf32, #tpu.memory_space<vmem>>, %arg4: memref<8x1x128xf32, #tpu.memory_space<vmem>>) attributes {dimension_semantics = [#tpu.dimension_semantics<parallel>, #tpu.dimension_semantics<arbitrary>], iteration_bounds = array<i64: 1, 1>, scalar_prefetch = 0 : i64, scratch_operands = 1 : i64, tpu.core_type = #tpu.core_type<tc>, window_params = [{transform_indices = @transform_0, window_bounds = array<i64: 10, 1, 128>}, {transform_indices = @transform_1, window_bounds = array<i64: 1, 8, 128>}]} {
    %c0_i32 = arith.constant 0 : i32
    %0 = arith.cmpi eq, %arg1, %c0_i32 : i32
    %1 = arith.extui %0 : i1 to i32
    %c0_i32_0 = arith.constant 0 : i32
    %2 = arith.cmpi ne, %1, %c0_i32_0 : i32
    scf.if %2 {
      %cst_31 = arith.constant 0.000000e+00 : f32
      %73 = vector.broadcast %cst_31 : f32 to vector<8x1x128xf32>
      %c0_32 = arith.constant 0 : index
      %c0_33 = arith.constant 0 : index
      %c0_34 = arith.constant 0 : index
      %74 = vector.load %arg4[%c0_32, %c0_33, %c0_34] : memref<8x1x128xf32, #tpu.memory_space<vmem>>, vector<8x1x128xf32>
      tpu.vector_store %arg4[%c0_32, %c0_33, %c0_34], %73 {strides = array<i32>} : memref<8x1x128xf32, #tpu.memory_space<vmem>>, vector<8x1x128xf32>,
    } else {
    }
    %c0 = arith.constant 0 : index
    %c0_1 = arith.constant 0 : index
    %c0_2 = arith.constant 0 : index
    %3 = vector.load %arg2[%c0, %c0_1, %c0_2] : memref<10x1x128xf32, #tpu.memory_space<vmem>>, vector<10x1x128xf32>
    %4 = vector.extract_strided_slice %3 {offsets = [0, 0, 0], sizes = [1, 1, 128], strides = [1, 1, 1]} : vector<10x1x128xf32> to vector<1x1x128xf32>
    %5 = vector.shape_cast %4 : vector<1x1x128xf32> to vector<1x128xf32>
    %6 = vector.extract_strided_slice %3 {offsets = [1, 0, 0], sizes = [1, 1, 128], strides = [1, 1, 1]} : vector<10x1x128xf32> to vector<1x1x128xf32>
    %7 = vector.shape_cast %6 : vector<1x1x128xf32> to vector<1x128xf32>
    %cst = arith.constant 0.000000e+00 : f32
    %8 = vector.broadcast %cst : f32 to vector<1x128xf32>
    %9 = arith.maximumf %5, %8 : vector<1x128xf32>
    %10 = arith.mulf %5, %7 : vector<1x128xf32>
    %11 = arith.subf %9, %10 : vector<1x128xf32>
    %12 = math.absf %5 : vector<1x128xf32>
    %cst_3 = arith.constant 0.000000e+00 : f32
    %13 = vector.broadcast %cst_3 : f32 to vector<1x128xf32>
    %14 = arith.subf %13, %12 : vector<1x128xf32>
    %15 = math.exp %14 : vector<1x128xf32>
    %16 = math.log1p %15 : vector<1x128xf32>
    %17 = arith.addf %11, %16 : vector<1x128xf32>
    %cst_4 = arith.constant 1.000000e+00 : f32
    %18 = vector.broadcast %cst_4 : f32 to vector<1x128xf32>
    %19 = arith.cmpf oeq, %7, %18 : vector<1x128xf32>
    %20 = arith.extui %19 : vector<1x128xi1> to vector<1x128xi32>
    %21 = arith.sitofp %20 : vector<1x128xi32> to vector<1x128xf32>
    %22 = vector.extract_strided_slice %3 {offsets = [2, 0, 0], sizes = [4, 1, 128], strides = [1, 1, 1]} : vector<10x1x128xf32> to vector<4x1x128xf32>
    %23 = vector.extract_strided_slice %3 {offsets = [6, 0, 0], sizes = [4, 1, 128], strides = [1, 1, 1]} : vector<10x1x128xf32> to vector<4x1x128xf32>
    %24 = arith.subf %22, %23 : vector<4x1x128xf32>
    %25 = math.absf %24 : vector<4x1x128xf32>
    %cst_5 = arith.constant 1.000000e+00 : f32
    %26 = vector.broadcast %cst_5 : f32 to vector<4x1x128xf32>
    %27 = arith.cmpf olt, %25, %26 : vector<4x1x128xf32>
    %cst_6 = arith.constant 5.000000e-01 : f32
    %28 = vector.broadcast %cst_6 : f32 to vector<4x1x128xf32>
    %29 = arith.mulf %28, %24 : vector<4x1x128xf32>
    %30 = arith.mulf %29, %24 : vector<4x1x128xf32>
    %cst_7 = arith.constant 5.000000e-01 : f32
    %31 = vector.broadcast %cst_7 : f32 to vector<4x1x128xf32>
    %32 = arith.subf %25, %31 : vector<4x1x128xf32>
    %33 = arith.select %27, %30, %32 : vector<4x1x128xi1>, vector<4x1x128xf32>
    %c0_8 = arith.constant 0 : index
    %c0_9 = arith.constant 0 : index
    %c0_10 = arith.constant 0 : index
    %34 = vector.load %arg4[%c0_8, %c0_9, %c0_10] : memref<8x1x128xf32, #tpu.memory_space<vmem>>, vector<1x1x128xf32>
    %35 = vector.shape_cast %34 : vector<1x1x128xf32> to vector<1x128xf32>
    %36 = arith.addf %35, %17 : vector<1x128xf32>
    %c0_11 = arith.constant 0 : index
    %c0_12 = arith.constant 0 : index
    %c0_13 = arith.constant 0 : index
    %37 = vector.load %arg4[%c0_11, %c0_12, %c0_13] : memref<8x1x128xf32, #tpu.memory_space<vmem>>, vector<1x1x128xf32>
    %38 = vector.shape_cast %37 : vector<1x1x128xf32> to vector<1x128xf32>
    %39 = vector.shape_cast %36 : vector<1x128xf32> to vector<1x1x128xf32>
    tpu.vector_store %arg4[%c0_11, %c0_12, %c0_13], %39 {strides = array<i32>} : memref<8x1x128xf32, #tpu.memory_space<vmem>>, vector<1x1x128xf32>,
    %c1 = arith.constant 1 : index
    %c0_14 = arith.constant 0 : index
    %c0_15 = arith.constant 0 : index
    %40 = vector.load %arg4[%c1, %c0_14, %c0_15] : memref<8x1x128xf32, #tpu.memory_space<vmem>>, vector<1x1x128xf32>
    %41 = vector.shape_cast %40 : vector<1x1x128xf32> to vector<1x128xf32>
    %42 = vector.extract_strided_slice %33 {offsets = [0, 0, 0], sizes = [1, 1, 128], strides = [1, 1, 1]} : vector<4x1x128xf32> to vector<1x1x128xf32>
    %43 = vector.shape_cast %42 : vector<1x1x128xf32> to vector<1x128xf32>
    %44 = vector.extract_strided_slice %33 {offsets = [1, 0, 0], sizes = [1, 1, 128], strides = [1, 1, 1]} : vector<4x1x128xf32> to vector<1x1x128xf32>
    %45 = vector.shape_cast %44 : vector<1x1x128xf32> to vector<1x128xf32>
    %46 = arith.addf %43, %45 : vector<1x128xf32>
    %47 = arith.mulf %46, %21 : vector<1x128xf32>
    %48 = arith.addf %41, %47 : vector<1x128xf32>
    %c1_16 = arith.constant 1 : index
    %c0_17 = arith.constant 0 : index
    %c0_18 = arith.constant 0 : index
    %49 = vector.load %arg4[%c1_16, %c0_17, %c0_18] : memref<8x1x128xf32, #tpu.memory_space<vmem>>, vector<1x1x128xf32>
    %50 = vector.shape_cast %49 : vector<1x1x128xf32> to vector<1x128xf32>
    %51 = vector.shape_cast %48 : vector<1x128xf32> to vector<1x1x128xf32>
    tpu.vector_store %arg4[%c1_16, %c0_17, %c0_18], %51 {strides = array<i32>} : memref<8x1x128xf32, #tpu.memory_space<vmem>>, vector<1x1x128xf32>,
    %c2 = arith.constant 2 : index
    %c0_19 = arith.constant 0 : index
    %c0_20 = arith.constant 0 : index
    %52 = vector.load %arg4[%c2, %c0_19, %c0_20] : memref<8x1x128xf32, #tpu.memory_space<vmem>>, vector<1x1x128xf32>
    %53 = vector.shape_cast %52 : vector<1x1x128xf32> to vector<1x128xf32>
    %54 = vector.extract_strided_slice %25 {offsets = [2, 0, 0], sizes = [1, 1, 128], strides = [1, 1, 1]} : vector<4x1x128xf32> to vector<1x1x128xf32>
    %55 = vector.shape_cast %54 : vector<1x1x128xf32> to vector<1x128xf32>
    %56 = vector.extract_strided_slice %25 {offsets = [3, 0, 0], sizes = [1, 1, 128], strides = [1, 1, 1]} : vector<4x1x128xf32> to vector<1x1x128xf32>
    %57 = vector.shape_cast %56 : vector<1x1x128xf32> to vector<1x128xf32>
    %58 = arith.addf %55, %57 : vector<1x128xf32>
    %59 = arith.mulf %58, %21 : vector<1x128xf32>
    %60 = arith.addf %53, %59 : vector<1x128xf32>
    %c2_21 = arith.constant 2 : index
    %c0_22 = arith.constant 0 : index
    %c0_23 = arith.constant 0 : index
    %61 = vector.load %arg4[%c2_21, %c0_22, %c0_23] : memref<8x1x128xf32, #tpu.memory_space<vmem>>, vector<1x1x128xf32>
    %62 = vector.shape_cast %61 : vector<1x1x128xf32> to vector<1x128xf32>
    %63 = vector.shape_cast %60 : vector<1x128xf32> to vector<1x1x128xf32>
    tpu.vector_store %arg4[%c2_21, %c0_22, %c0_23], %63 {strides = array<i32>} : memref<8x1x128xf32, #tpu.memory_space<vmem>>, vector<1x1x128xf32>,
    %c3 = arith.constant 3 : index
    %c0_24 = arith.constant 0 : index
    %c0_25 = arith.constant 0 : index
    %64 = vector.load %arg4[%c3, %c0_24, %c0_25] : memref<8x1x128xf32, #tpu.memory_space<vmem>>, vector<1x1x128xf32>
    %65 = vector.shape_cast %64 : vector<1x1x128xf32> to vector<1x128xf32>
    %66 = arith.addf %65, %21 : vector<1x128xf32>
    %c3_26 = arith.constant 3 : index
    %c0_27 = arith.constant 0 : index
    %c0_28 = arith.constant 0 : index
    %67 = vector.load %arg4[%c3_26, %c0_27, %c0_28] : memref<8x1x128xf32, #tpu.memory_space<vmem>>, vector<1x1x128xf32>
    %68 = vector.shape_cast %67 : vector<1x1x128xf32> to vector<1x128xf32>
    %69 = vector.shape_cast %66 : vector<1x128xf32> to vector<1x1x128xf32>
    tpu.vector_store %arg4[%c3_26, %c0_27, %c0_28], %69 {strides = array<i32>} : memref<8x1x128xf32, #tpu.memory_space<vmem>>, vector<1x1x128xf32>,
    %c0_i32_29 = arith.constant 0 : i32
    %70 = arith.cmpi eq, %arg1, %c0_i32_29 : i32
    %71 = arith.extui %70 : i1 to i32
    %c0_i32_30 = arith.constant 0 : i32
    %72 = arith.cmpi ne, %71, %c0_i32_30 : i32
    scf.if %72 {
      %c0_31 = arith.constant 0 : index
      %c0_32 = arith.constant 0 : index
      %c0_33 = arith.constant 0 : index
      %73 = vector.load %arg4[%c0_31, %c0_32, %c0_33] : memref<8x1x128xf32, #tpu.memory_space<vmem>>, vector<8x1x128xf32>
      %cst_34 = arith.constant dense<0.000000e+00> : vector<8x128xf32>
      %74 = vector.multi_reduction <add>, %73, %cst_34 [1] : vector<8x1x128xf32> to vector<8x128xf32>
      %75 = vector.shape_cast %74 : vector<8x128xf32> to vector<1x8x128xf32>
      %c0_35 = arith.constant 0 : index
      %c0_36 = arith.constant 0 : index
      %c0_37 = arith.constant 0 : index
      %76 = vector.load %arg3[%c0_35, %c0_36, %c0_37] : memref<1x8x128xf32, #tpu.memory_space<vmem>>, vector<1x8x128xf32>
      tpu.vector_store %arg3[%c0_35, %c0_36, %c0_37], %75 {strides = array<i32>} : memref<1x8x128xf32, #tpu.memory_space<vmem>>, vector<1x8x128xf32>,
    } else {
    }
    return
  }
  func.func @transform_0(%arg0: i32, %arg1: i32) -> (i32, i32, i32) {
    %c1_i32 = arith.constant 1 : i32
    %0 = arith.muli %arg0, %c1_i32 : i32
    %1 = arith.addi %0, %arg1 : i32
    %c0_i32 = arith.constant 0 : i32
    %c0_i32_0 = arith.constant 0 : i32
    %c0_i32_1 = arith.constant 0 : i32
    return %c0_i32, %1, %c0_i32_0 : i32, i32, i32
  }
  func.func @transform_1(%arg0: i32, %arg1: i32) -> (i32, i32, i32) {
    %c0_i32 = arith.constant 0 : i32
    %c0_i32_0 = arith.constant 0 : i32
    %c0_i32_1 = arith.constant 0 : i32
    return %arg0, %c0_i32, %c0_i32_0 : i32, i32, i32
  }
}

</mosaic_0001>

<bundles_post_ra>
// kernel: combined_loss_device.2
= control target key start
LH: loop header
LB: loop body
LE: loop exit
PB: predicated region body
PF: predicated region fallthrough
CT: control target
= control target key end

     0   :  { %v243_v10 = vmov 0.0   ;;  %v244_v62 = vmov 1966171168   ;;  %s294_s0 = inlined_call_operand.vmem [shape: f32[10,128], index: 0, kind: input, shape index: {}]   ;;  %s295_s1 = inlined_call_operand.vmem [shape: f32[1,8,128], index: 1, kind: output, shape index: {}]  }
   0x1   :  { %v14_v0 = vld [vmem:[%s294_s0] ss:$0 sm:$0xff]  ;;  %v225_v1 = vld [vmem:[%s294_s0 + $0x1] ss:$0 sm:$0xff]  ;;  %v226_v2 = vld [vmem:[%s294_s0 + $0x2] ss:$0 sm:$0xff]  ;;  %v174_v63 = vunpack.c.l.s4 %v244_v62 }
   0x2   :  { %16 = vst [vmem:[#allocation3] sm:$0x1] %v14_v0  ;;  %21 = vst [vmem:[#allocation3 + $0x1] sm:$0x1] %v225_v1  ;;  %v227_v3 = vld [vmem:[%s294_s0 + $0x3] ss:$0 sm:$0xff]  ;;  %v176_v0 = vlaneseq }
   0x3   :  { %26 = vst [vmem:[#allocation3 + $0x2] sm:$0x1] %v226_v2  ;;  %v228_v4 = vld [vmem:[%s294_s0 + $0x4] ss:$0 sm:$0xff]  ;;  %v229_v5 = vld [vmem:[%s294_s0 + $0x5] ss:$0 sm:$0xff] }
   0x4   :  { %31 = vst [vmem:[#allocation3 + $0x3] sm:$0x1] %v227_v3  ;;  %36 = vst [vmem:[#allocation3 + $0x4] sm:$0x1] %v228_v4  ;;  %v230_v6 = vld [vmem:[%s294_s0 + $0x6] ss:$0 sm:$0xff] }
   0x5   :  { %41 = vst [vmem:[#allocation3 + $0x5] sm:$0x1] %v229_v5  ;;  %v231_v7 = vld [vmem:[%s294_s0 + $0x7] ss:$0 sm:$0xff]  ;;  %v232_v8 = vld [vmem:[%s294_s0 + $0x8] ss:$0 sm:$0xff] }
   0x6   :  { %46 = vst [vmem:[#allocation3 + $0x6] sm:$0x1] %v230_v6  ;;  %51 = vst [vmem:[#allocation3 + $0x7] sm:$0x1] %v231_v7  ;;  %v233_v9 = vld [vmem:[%s294_s0 + $0x9] ss:$0 sm:$0xff]  ;;  %v175_v6 = vunpack.c.0.s8 %v174_v63 }
   0x7   :  { %56 = vst [vmem:[#allocation3 + $0x8] sm:$0x1] %v232_v8  ;;  %62 = vst [vmem:[#allocation3 + $0x9] sm:$0x1] %v233_v9  ;;  %v177_v7 = vshrl.u32 %v176_v0, 7 }
   0x8   :  { %67 = vst [vmem:[#allocation2] sm:$0x1] %v243_v10  ;;  %68 = vst [vmem:[#allocation2 + $0x1] sm:$0x1] %v243_v10 }
   0x9   :  { %69 = vst [vmem:[#allocation2 + $0x2] sm:$0x1] %v243_v10  ;;  %70 = vst [vmem:[#allocation2 + $0x3] sm:$0x1] %v243_v10  ;;  %v75_v11 = vld [vmem:[#allocation3] sm:$0x1] }
   0xa   :  { %71 = vst [vmem:[#allocation2 + $0x4] sm:$0x1] %v243_v10  ;;  %72 = vst [vmem:[#allocation2 + $0x5] sm:$0x1] %v243_v10  ;;  %v76_v12 = vld [vmem:[#allocation3 + $0x1] sm:$0x1] }
   0xb   :  { %73 = vst [vmem:[#allocation2 + $0x6] sm:$0x1] %v243_v10  ;;  %74 = vst [vmem:[#allocation2 + $0x7] sm:$0x1] %v243_v10  ;;  %v77_v13 = vld [vmem:[#allocation3 + $0x2] sm:$0x1]  ;;  %v86_v57 = vmul.f32 %v76_v12, %v75_v11 }
   0xc   :  { %v78_v14 = vld [vmem:[#allocation3 + $0x3] sm:$0x1]  ;;  %v79_v15 = vld [vmem:[#allocation3 + $0x4] sm:$0x1]  ;;  %v80_v16 = vld [vmem:[#allocation3 + $0x5] sm:$0x1] }
   0xd   :  { %v81_v17 = vld [vmem:[#allocation3 + $0x6] sm:$0x1]  ;;  %v82_v18 = vld [vmem:[#allocation3 + $0x7] sm:$0x1]  ;;  %v88_v21 = vand.u32 2147483647, %v75_v11 }
   0xe   :  { %v83_v19 = vld [vmem:[#allocation3 + $0x8] sm:$0x1]  ;;  %v84_v20 = vld [vmem:[#allocation3 + $0x9] sm:$0x1]  ;;  %vm102_vm0 = vcmp.eq.f32.partialorder %v76_v12, 1.0  ;;  %v105_v22 = vsub.f32 %v77_v13, %v81_v17  ;;  %v106_v23 = vsub.f32 %v78_v14, %v82_v18  ;;  %v85_v56 = vmax.f32 %v75_v11, 0.0 }
   0xf   :  { %v107_v24 = vsub.f32 %v79_v15, %v83_v19  ;;  %v108_v25 = vsub.f32 %v80_v16, %v84_v20  ;;  %v89_v26 = vsub.f32 0.0, %v88_v21  ;;  %v234_v27 = vsel %vm102_vm0, 1.0, %v243_v10  ;;  %v127_v49 = vld [vmem:[#allocation2 + $0x1] sm:$0x1]  ;;  %v123_v3 = vld [vmem:[#allocation2] sm:$0x1] }
  0x10   :  { %v109_v28 = vand.u32 2147483647, %v105_v22  ;;  %v115_v29 = vmul.f32 0.5, %v105_v22  ;;  %v110_v30 = vand.u32 2147483647, %v106_v23  ;;  %v116_v35 = vmul.f32 0.5, %v106_v23 }
  0x11   :  { %v111_v31 = vand.u32 2147483647, %v107_v24  ;;  %v112_v32 = vand.u32 2147483647, %v108_v25  ;;  %v90_v33 = vmul.f32 1.442695, %v89_v26  ;;  %v87_v61 = vsub.f32 %v85_v56, %v86_v57 }
  0x12   :  { %vm285_vm1 = vcmp.lt.f32.partialorder %v109_v28, 1.0  ;;  %v117_v36 = vmul.f32 %v115_v29, %v105_v22  ;;  %v139_v37 = vld [vmem:[#allocation2 + $0x3] sm:$0x1]  ;;  %vm114_vm2 = vcmp.lt.f32.partialorder %v110_v30, 1.0  ;;  %v235_v38 = vadd.f32 -0.5, %v109_v28 }
  0x13   :  { %v236_v39 = vadd.f32 -0.5, %v110_v30  ;;  %v134_v40 = vadd.f32 %v112_v32, %v111_v31  ;;  %239 = vpow2.f32 %v90_v33  ;;  %v118_v41 = vmul.f32 %v116_v35, %v106_v23  ;;  %v133_v42 = vld [vmem:[#allocation2 + $0x2] sm:$0x1]  ;;  %v149_v5 = vld [vmem:[#allocation2 + $0x4] sm:$0x1] }
  0x14   :  { %v140_v43 = vadd.f32 %v234_v27, %v139_v37  ;;  %v121_v44 = vsel %vm285_vm1, %v117_v36, %v235_v38  ;;  %v150_v8 = vld [vmem:[#allocation2 + $0x5] sm:$0x1]  ;;  %v151_v9 = vld [vmem:[#allocation2 + $0x6] sm:$0x1]  ;;  %v152_v10 = vld [vmem:[#allocation2 + $0x7] sm:$0x1]  ;;  %v178_v14 = vsub.s32 %v175_v6, %v177_v7 }
  0x15   :  { %v135_v45 = vmul.f32 %v234_v27, %v134_v40  ;;  %v122_v46 = vsel %vm114_vm2, %v118_v41, %v236_v39  ;;  %v171_v11 = vcombine.low %v149_v5, %v150_v8  ;;  %v172_v12 = vcombine.low %v151_v9, %v152_v10 }
  0x16   :  { %141 = vst [vmem:[#allocation2 + $0x3] sm:$0x1] %v140_v43  ;;  %v128_v47 = vadd.f32 %v122_v46, %v121_v44 }
  0x17   :  { %v136_v48 = vadd.f32 %v135_v45, %v133_v42  ;;  %v193_v18 = vrot.slane %v171_v11, %v178_v14  ;;  %v200_v19 = vrot.slane %v172_v12, %v178_v14 }
  0x18   :  { %v129_v50 = vmul.f32 %v234_v27, %v128_v47 }
  0x19   :  { %137 = vst [vmem:[#allocation2 + $0x2] sm:$0x1] %v136_v48  ;;  %v202_v24 = vcombine.low %v193_v18, %v200_v19 }
  0x1a   :  { %v130_v51 = vadd.f32 %v129_v50, %v127_v49 }
  0x1b   :  { %v216_v27 = vrot.slane %v202_v24, %v178_v14 }
  0x1c   :  { %131 = vst [vmem:[#allocation2 + $0x1] sm:$0x1] %v130_v51 }
  0x1d   :  { %v240_v52 = vpop.eup %239  ;;  %v148_v16 = vld [vmem:[#allocation2 + $0x3] sm:$0x1] }
  0x1e   :  { %v92_v53 = vadd.f32 1.0, %v240_v52  ;;  %v95_v54 = vmul.f32 -0.5, %v240_v52  ;;  %v98_v58 = vand.u32 2147483647, %v240_v52 }
  0x20   :  { %241 = vlog2.f32 %v92_v53  ;;  %v96_v55 = vadd.f32 1.0, %v95_v54  ;;  %vm99_vm3 = vcmp.lt.f32.partialorder %v98_v58, 0.0004427343  ;;  %v147_v15 = vld [vmem:[#allocation2 + $0x2] sm:$0x1] }
  0x21   :  { %v170_v17 = vcombine.low %v147_v15, %v148_v16 }
  0x22   :  { %v97_v59 = vmul.f32 %v240_v52, %v96_v55 }
  0x23   :  { %v146_v20 = vld [vmem:[#allocation2 + $0x1] sm:$0x1]  ;;  %v186_v23 = vrot.slane %v170_v17, %v178_v14 }
  0x2a   :  { %v242_v60 = vpop.eup %241 }
  0x2b   :  { %v94_v1 = vmul.f32 0.6931472, %v242_v60 }
  0x2d   :  { %v100_v2 = vsel %vm99_vm3, %v97_v59, %v94_v1 }
  0x2e   :  { %v101_v4 = vadd.f32 %v100_v2, %v87_v61 }
  0x30   :  { %v124_v13 = vadd.f32 %v123_v3, %v101_v4 }
  0x32   :  { %125 = vst [vmem:[#allocation2] sm:$0x1] %v124_v13 }
  0x39   :  { %v145_v21 = vld [vmem:[#allocation2] sm:$0x1] }
  0x3a   :  { %v169_v22 = vcombine.low %v145_v21, %v146_v20 }
  0x3c   :  { %v179_v25 = vrot.slane %v169_v22, %v178_v14 }
  0x3e   :  { %v201_v26 = vcombine.low %v179_v25, %v186_v23 }
  0x40   :  { %v209_v28 = vrot.slane %v201_v26, %v178_v14 }
  0x42   :  { %v217_v29 = vcombine.low %v209_v28, %v216_v27 }
  0x44   :  { %219 = vst [vmem:[%s295_s1] sm:$0xff] %v217_v29 }

</bundles_post_ra>
